<compile_context>
chip_gen: v7x
topology: tpu7x:2x2x1
jax: 0.10.0
libtpu: 0.0.40
codegen_flags: <defaults>
</compile_context>

<pallas_src>
import functools

import jax
import jax.numpy as jnp
from jax import lax
from jax.experimental import pallas as pl
from jax.experimental.pallas import tpu as pltpu

D = 12 * 12                 # 144 flattened spatial dim
SCALE = float(D) ** (-0.5)


def _attention_kernel(x_ref, wqkv_ref, wo_ref, b_ref, o_ref, *, B, F, A):
    # x_ref:    (B*F, D)   VMEM  flattened input
    # wqkv_ref: (D, 3*D)   VMEM  fused qkv weight, (in, out) layout
    # wo_ref:   (A, D)     VMEM  out_proj weight (nn.Linear storage layout)
    # b_ref:    (1, A)     SMEM if A == 1 else VMEM
    # o_ref:    (B, F, A)  VMEM
    x = x_ref[...]                                                        # (B*F, D)
    # Single fused QKV projection (one MXU weight push, N = 3*D).
    qkv = jnp.dot(x, wqkv_ref[...], preferred_element_type=jnp.float32)   # (B*F, 3D)
    wo = wo_ref[...]                                                      # (A, D)

    for b in range(B):  # B is tiny and static -> fully unrolled, no carried state
        q = qkv[b * F:(b + 1) * F, 0 * D:1 * D]                           # (F, D)
        k = qkv[b * F:(b + 1) * F, 1 * D:2 * D]
        v = qkv[b * F:(b + 1) * F, 2 * D:3 * D]

        # scores = q @ k^T : contract shared last dims, no transpose materialized.
        scores = lax.dot_general(
            q, k, (((1,), (1,)), ((), ())),
            preferred_element_type=jnp.float32) * SCALE                   # (F, F)

        # numerically-stable softmax (matches torch.softmax)
        m = jnp.max(scores, axis=-1, keepdims=True)
        e = jnp.exp(scores - m)
        denom = jnp.sum(e, axis=-1, keepdims=True)
        probs = e * pl.reciprocal(denom, approx=True)                     # EUP vrcp

        attn = jnp.dot(probs, v, preferred_element_type=jnp.float32)      # (F, D)

        if A == 1:
            # Matrix-vector out-projection on VPU/XLU; scalar bias read from SMEM.
            out_b = jnp.sum(attn * wo, axis=-1, keepdims=True) + b_ref[0, 0]  # (F, 1)
        else:
            out_b = lax.dot_general(
                attn, wo, (((1,), (1,)), ((), ())),
                preferred_element_type=jnp.float32)                       # (F, A)
            out_b = out_b + b_ref[...]
        o_ref[b] = out_b.astype(o_ref.dtype)


def attention_block(x, w_qkv, w_out, b_out):
    """x: (B, F, 12, 12) f32; w_qkv: (3*D, D); w_out: (A, D); b_out: (A,)."""
    B, F, h, w = x.shape
    assert h == 12 and w == 12, "Expected input shape [B, F, 12, 12]"
    A = w_out.shape[0]

    x2d = x.reshape(B * F, D).astype(jnp.float32)   # flatten batch*tokens for fused dot
    wqkv_t = w_qkv.T                                # (D, 3D), (in, out) layout
    b2 = b_out.reshape(1, A).astype(jnp.float32)

    bias_space = pltpu.MemorySpace.SMEM if A == 1 else pltpu.MemorySpace.VMEM

    flops = (2 * B * F * D * 3 * D      # fused qkv projection
             + 2 * B * F * F * D        # q @ k^T
             + 2 * B * F * F * D        # probs @ v
             + 2 * B * F * D * A)       # out projection
    bytes_accessed = 4 * (x2d.size + wqkv_t.size + w_out.size + b2.size + B * F * A)

    kernel = functools.partial(_attention_kernel, B=B, F=F, A=A)
    return pl.pallas_call(
        kernel,
        out_shape=jax.ShapeDtypeStruct((B, F, A), x.dtype),
        in_specs=[
            pl.BlockSpec(memory_space=pltpu.MemorySpace.VMEM),   # x2d
            pl.BlockSpec(memory_space=pltpu.MemorySpace.VMEM),   # fused qkv weight
            pl.BlockSpec(memory_space=pltpu.MemorySpace.VMEM),   # out_proj weight
            pl.BlockSpec(memory_space=bias_space),               # out_proj bias
        ],
        out_specs=pl.BlockSpec(memory_space=pltpu.MemorySpace.VMEM),
        cost_estimate=pl.CostEstimate(
            flops=flops,
            transcendentals=B * F * F,          # exp count
            bytes_accessed=bytes_accessed),
    )(x2d, wqkv_t, w_out, b2)


def _reference(x, w_qkv, w_out, b_out):
    B, F, _, _ = x.shape
    xf = x.reshape(B, F, D)
    qkv = jnp.einsum("bfd,od->bfo", xf, w_qkv)
    q, k, v = jnp.split(qkv, 3, axis=-1)
    scores = jnp.einsum("bqd,bkd->bqk", q, k) * SCALE
    probs = jax.nn.softmax(scores, axis=-1)
    attn = jnp.einsum("bqk,bkd->bqd", probs, v)
    return jnp.einsum("bfd,ad->bfa", attn, w_out) + b_out


if __name__ == "__main__":
    B, F, A = 2, 16, 1  # batch=2, num_features=16, attention_value=1

    key = jax.random.PRNGKey(0)
    kx, kqkv, kwo, kbo = jax.random.split(key, 4)

    x = jax.random.normal(kx, (B, F, 12, 12), dtype=jnp.float32)
    # Deterministic synthetic params, scaled like nn.Linear's default init range.
    w_qkv = jax.random.uniform(kqkv, (3 * D, D), jnp.float32, -1.0, 1.0) / jnp.sqrt(D)
    w_out = jax.random.uniform(kwo, (A, D), jnp.float32, -1.0, 1.0) / jnp.sqrt(D)
    b_out = jax.random.uniform(kbo, (A,), jnp.float32, -1.0, 1.0) / jnp.sqrt(D)

    out = attention_block(x, w_qkv, w_out, b_out)
    out = jax.block_until_ready(out)

    ref = _reference(x, w_qkv, w_out, b_out)
    assert out.shape == (B, F, A)
    # tolerance slightly relaxed vs 1e-4 because softmax uses the EUP approx reciprocal
    assert jnp.allclose(out, ref, atol=2e-3, rtol=2e-3), "mismatch vs reference"

    print("KERNEL_OK")
</pallas_src>

<mosaic_0001>
module attributes {stable_mosaic.version = 11 : i64} {
  func.func @_attention_kernel(%arg0: memref<32x144xf32, #tpu.memory_space<vmem>>, %arg1: memref<144x432xf32, #tpu.memory_space<vmem>>, %arg2: memref<1x144xf32, #tpu.memory_space<vmem>>, %arg3: memref<1x1xf32, #tpu.memory_space<smem>>, %arg4: memref<2x16x1xf32, #tpu.memory_space<vmem>>) attributes {dimension_semantics = [], scalar_prefetch = 0 : i64, scratch_operands = 0 : i64, tpu.core_type = #tpu.core_type<tc>} {
    %c0 = arith.constant 0 : index
    %c0_0 = arith.constant 0 : index
    %0 = vector.load %arg0[%c0, %c0_0] : memref<32x144xf32, #tpu.memory_space<vmem>>, vector<32x144xf32>
    %c0_1 = arith.constant 0 : index
    %c0_2 = arith.constant 0 : index
    %1 = vector.load %arg1[%c0_1, %c0_2] : memref<144x432xf32, #tpu.memory_space<vmem>>, vector<144x432xf32>
    %cst = arith.constant dense<0.000000e+00> : vector<32x432xf32>
    %2 = tpu.matmul %0, %1, %cst {dimension_numbers = #tpu.dot_dimension_numbers<[1], [0], [0], [1], [0, 0, 1, 1], [], []>} : vector<32x144xf32>, vector<144x432xf32>, vector<32x432xf32> -> vector<32x432xf32>
    %c0_3 = arith.constant 0 : index
    %c0_4 = arith.constant 0 : index
    %3 = vector.load %arg2[%c0_3, %c0_4] : memref<1x144xf32, #tpu.memory_space<vmem>>, vector<1x144xf32>
    %4 = vector.extract_strided_slice %2 {offsets = [0, 0], sizes = [16, 144], strides = [1, 1]} : vector<32x432xf32> to vector<16x144xf32>
    %5 = vector.extract_strided_slice %2 {offsets = [0, 144], sizes = [16, 144], strides = [1, 1]} : vector<32x432xf32> to vector<16x144xf32>
    %6 = vector.extract_strided_slice %2 {offsets = [0, 288], sizes = [16, 144], strides = [1, 1]} : vector<32x432xf32> to vector<16x144xf32>
    %cst_5 = arith.constant dense<0.000000e+00> : vector<16x16xf32>
    %7 = tpu.matmul %4, %5, %cst_5 {dimension_numbers = #tpu.dot_dimension_numbers<[1], [1], [0], [0], [0, 0, 1, 0], [], []>} : vector<16x144xf32>, vector<16x144xf32>, vector<16x16xf32> -> vector<16x16xf32>
    %cst_6 = arith.constant 0.0833333358 : f32
    %8 = vector.broadcast %cst_6 : f32 to vector<16x16xf32>
    %9 = arith.mulf %7, %8 : vector<16x16xf32>
    %cst_7 = arith.constant dense<0xFF800000> : vector<16xf32>
    %10 = vector.multi_reduction <maximumf>, %9, %cst_7 [1] : vector<16x16xf32> to vector<16xf32>
    %11 = vector.shape_cast %10 : vector<16xf32> to vector<16x1xf32>
    %12 = vector.broadcast %11 : vector<16x1xf32> to vector<16x16xf32>
    %13 = arith.subf %9, %12 : vector<16x16xf32>
    %14 = math.exp %13 : vector<16x16xf32>
    %cst_8 = arith.constant dense<0.000000e+00> : vector<16xf32>
    %15 = vector.multi_reduction <add>, %14, %cst_8 [1] : vector<16x16xf32> to vector<16xf32>
    %16 = vector.shape_cast %15 : vector<16xf32> to vector<16x1xf32>
    %17 = tpu.reciprocal %16 {approx = true} : vector<16x1xf32> -> vector<16x1xf32>
    %18 = vector.broadcast %17 : vector<16x1xf32> to vector<16x16xf32>
    %19 = arith.mulf %14, %18 : vector<16x16xf32>
    %cst_9 = arith.constant dense<0.000000e+00> : vector<16x144xf32>
    %20 = tpu.matmul %19, %6, %cst_9 {dimension_numbers = #tpu.dot_dimension_numbers<[1], [0], [0], [1], [0, 0, 1, 1], [], []>} : vector<16x16xf32>, vector<16x144xf32>, vector<16x144xf32> -> vector<16x144xf32>
    %21 = vector.broadcast %3 : vector<1x144xf32> to vector<16x144xf32>
    %22 = arith.mulf %20, %21 : vector<16x144xf32>
    %cst_10 = arith.constant dense<0.000000e+00> : vector<16xf32>
    %23 = vector.multi_reduction <add>, %22, %cst_10 [1] : vector<16x144xf32> to vector<16xf32>
    %24 = vector.shape_cast %23 : vector<16xf32> to vector<16x1xf32>
    %c0_11 = arith.constant 0 : index
    %c0_12 = arith.constant 0 : index
    %25 = memref.load %arg3[%c0_11, %c0_12] : memref<1x1xf32, #tpu.memory_space<smem>>
    %26 = vector.broadcast %25 : f32 to vector<16x1xf32>
    %27 = arith.addf %24, %26 : vector<16x1xf32>
    %c0_13 = arith.constant 0 : index
    %c0_14 = arith.constant 0 : index
    %c0_15 = arith.constant 0 : index
    %28 = vector.load %arg4[%c0_13, %c0_14, %c0_15] : memref<2x16x1xf32, #tpu.memory_space<vmem>>, vector<1x16x1xf32>
    %29 = vector.shape_cast %28 : vector<1x16x1xf32> to vector<16x1xf32>
    %30 = vector.shape_cast %27 : vector<16x1xf32> to vector<1x16x1xf32>
    tpu.vector_store %arg4[%c0_13, %c0_14, %c0_15], %30 {strides = array<i32>} : memref<2x16x1xf32, #tpu.memory_space<vmem>>, vector<1x16x1xf32>,
    %31 = vector.extract_strided_slice %2 {offsets = [16, 0], sizes = [16, 144], strides = [1, 1]} : vector<32x432xf32> to vector<16x144xf32>
    %32 = vector.extract_strided_slice %2 {offsets = [16, 144], sizes = [16, 144], strides = [1, 1]} : vector<32x432xf32> to vector<16x144xf32>
    %33 = vector.extract_strided_slice %2 {offsets = [16, 288], sizes = [16, 144], strides = [1, 1]} : vector<32x432xf32> to vector<16x144xf32>
    %cst_16 = arith.constant dense<0.000000e+00> : vector<16x16xf32>
    %34 = tpu.matmul %31, %32, %cst_16 {dimension_numbers = #tpu.dot_dimension_numbers<[1], [1], [0], [0], [0, 0, 1, 0], [], []>} : vector<16x144xf32>, vector<16x144xf32>, vector<16x16xf32> -> vector<16x16xf32>
    %cst_17 = arith.constant 0.0833333358 : f32
    %35 = vector.broadcast %cst_17 : f32 to vector<16x16xf32>
    %36 = arith.mulf %34, %35 : vector<16x16xf32>
    %cst_18 = arith.constant dense<0xFF800000> : vector<16xf32>
    %37 = vector.multi_reduction <maximumf>, %36, %cst_18 [1] : vector<16x16xf32> to vector<16xf32>
    %38 = vector.shape_cast %37 : vector<16xf32> to vector<16x1xf32>
    %39 = vector.broadcast %38 : vector<16x1xf32> to vector<16x16xf32>
    %40 = arith.subf %36, %39 : vector<16x16xf32>
    %41 = math.exp %40 : vector<16x16xf32>
    %cst_19 = arith.constant dense<0.000000e+00> : vector<16xf32>
    %42 = vector.multi_reduction <add>, %41, %cst_19 [1] : vector<16x16xf32> to vector<16xf32>
    %43 = vector.shape_cast %42 : vector<16xf32> to vector<16x1xf32>
    %44 = tpu.reciprocal %43 {approx = true} : vector<16x1xf32> -> vector<16x1xf32>
    %45 = vector.broadcast %44 : vector<16x1xf32> to vector<16x16xf32>
    %46 = arith.mulf %41, %45 : vector<16x16xf32>
    %cst_20 = arith.constant dense<0.000000e+00> : vector<16x144xf32>
    %47 = tpu.matmul %46, %33, %cst_20 {dimension_numbers = #tpu.dot_dimension_numbers<[1], [0], [0], [1], [0, 0, 1, 1], [], []>} : vector<16x16xf32>, vector<16x144xf32>, vector<16x144xf32> -> vector<16x144xf32>
    %48 = vector.broadcast %3 : vector<1x144xf32> to vector<16x144xf32>
    %49 = arith.mulf %47, %48 : vector<16x144xf32>
    %cst_21 = arith.constant dense<0.000000e+00> : vector<16xf32>
    %50 = vector.multi_reduction <add>, %49, %cst_21 [1] : vector<16x144xf32> to vector<16xf32>
    %51 = vector.shape_cast %50 : vector<16xf32> to vector<16x1xf32>
    %c0_22 = arith.constant 0 : index
    %c0_23 = arith.constant 0 : index
    %52 = memref.load %arg3[%c0_22, %c0_23] : memref<1x1xf32, #tpu.memory_space<smem>>
    %53 = vector.broadcast %52 : f32 to vector<16x1xf32>
    %54 = arith.addf %51, %53 : vector<16x1xf32>
    %c1 = arith.constant 1 : index
    %c0_24 = arith.constant 0 : index
    %c0_25 = arith.constant 0 : index
    %55 = vector.load %arg4[%c1, %c0_24, %c0_25] : memref<2x16x1xf32, #tpu.memory_space<vmem>>, vector<1x16x1xf32>
    %56 = vector.shape_cast %55 : vector<1x16x1xf32> to vector<16x1xf32>
    %57 = vector.shape_cast %54 : vector<16x1xf32> to vector<1x16x1xf32>
    tpu.vector_store %arg4[%c1, %c0_24, %c0_25], %57 {strides = array<i32>} : memref<2x16x1xf32, #tpu.memory_space<vmem>>, vector<1x16x1xf32>,
    return
  }
}

</mosaic_0001>

<bundles_post_ra>
// kernel: tpu_custom_call.1
= control target key start
LH: loop header
LB: loop body
LE: loop exit
PB: predicated region body
PF: predicated region fallthrough
CT: control target
= control target key end

     0   :  { %10 = vsyncpa [#allocation4], 0  ;;  %s1210_s0 = inlined_call_operand.hbm [shape: f32[32,144], index: 0, kind: input, shape index: {}]   ;;  %s1211_s1 = inlined_call_operand.hbm [shape: f32[144,432], index: 1, kind: input, shape index: {}]   ;;  %s1212_s2 = inlined_call_operand.vmem [shape: f32[1,144], index: 2, kind: input, shape index: {}]   ;;  %s1213_s3 = inlined_call_operand.<no memory space> [shape: f32[1,1], index: 3, kind: input, shape index: {}]   ;;  %s1214_s4 = inlined_call_operand.vmem [shape: f32[2,16,1], index: 4, kind: output, shape index: {}]  }
   0x1   :  { %11 = vsyncpa [#allocation6], 0  ;;  %s1044_s15 = smov [#allocation3]   ;;  %s996_s19 = scalar_lea.hbm %s1210_s0, 1024 }
   0x2   :  { %s17_s16 = sshll.u32 %s1044_s15, 4  ;;  %p997_p0 = scmp.ne.s32.totalorder %s1210_s0, %s996_s19  ;;  %s18_s16 = int_to_ptr.vmem [resolvable:$true] %s17_s16 }
   0x3   :  { %p1000_p1 = scmp.lt.u32.totalorder %s996_s19, %s1210_s0 }
   0x5   :  { %p1002_p2 = pnand %p1000_p1, %p997_p0 }
   0x7   :  { %1005 = shalt.err (!%p1002_p2)
}
   0x8   :  { %s1006_s24 = scalar_lea.vmem %s18_s16, 1024  ;;  %p1011_p4 = scmp.lt.s32.totalorder %s18_s16, %s18_s16 }
   0x9   :  { %p1007_p3 = scmp.ne.s32.totalorder %s18_s16, %s1006_s24  ;;  %p1012_p5 = scmp.lt.s32.totalorder %s1006_s24, %s1006_s24 }
   0xb   :  { %p1013_p6 = por %p1012_p5, %p1011_p4 }
   0xd   :  { %p1014_p7 = pnand %p1013_p6, %p1007_p3 }
   0xf   :  { %1017 = shalt.err (!%p1014_p7)
}
  0x10   :  { %s1045_s25 = smov 256   ;;  %s1046_s26 = smov 16  }
  0x11   :  { %23 = dma.hbm_to_vmem [thread:$0]  %s1210_s0, 1024, %s18_s16, [#allocation4], %s1045_s25, %s1045_s25, %s1046_s26  }
  0x12   :  { %s1047_s29 = smov [#allocation5]   ;;  %s1018_s7 = scalar_lea.hbm %s1211_s1, 9216 }
  0x13   :  { %s29_s30 = sshll.u32 %s1047_s29, 4  ;;  %p1019_p8 = scmp.ne.s32.totalorder %s1211_s1, %s1018_s7  ;;  %s30_s30 = int_to_ptr.vmem [resolvable:$true] %s29_s30 }
  0x14   :  { %p1022_p9 = scmp.lt.u32.totalorder %s1018_s7, %s1211_s1 }
  0x16   :  { %p1024_p10 = pnand %p1022_p9, %p1019_p8 }
  0x18   :  { %1027 = shalt.err (!%p1024_p10)
}
  0x19   :  { %s1028_s12 = scalar_lea.vmem %s30_s30, 9216  ;;  %p1033_p12 = scmp.lt.s32.totalorder %s30_s30, %s30_s30 }
  0x1a   :  { %p1029_p11 = scmp.ne.s32.totalorder %s30_s30, %s1028_s12  ;;  %p1034_p13 = scmp.lt.s32.totalorder %s1028_s12, %s1028_s12 }
  0x1c   :  { %p1035_p0 = por %p1034_p13, %p1033_p12 }
  0x1e   :  { %p1036_p1 = pnand %p1035_p0, %p1029_p11 }
  0x20   :  { %1039 = shalt.err (!%p1036_p1)
}
  0x21   :  { %s1048_s0 = smov 512   ;;  %s1049_s13 = smov 32  }
  0x22   :  { %35 = dma.hbm_to_vmem [thread:$0]  %s1211_s1, 9216, %s30_s30, [#allocation6], %s1048_s0, %s1048_s0, %s1049_s13  }
  0x23   :  { %1040 = dma.done.wait [#allocation4], 1024  }
  0x24   :  { %1041 = vsyncadd [#allocation4], 4294966272 }
  0x25   :  { %1042 = dma.done.wait [#allocation6], 9216  }
  0x26   :  { %1043 = vsyncadd [#allocation6], 4294958080  ;;  %v55_v0 = vld [vmem:[#allocation5 + $0x8] sm:$0xff]  ;;  %v57_v2 = vld [vmem:[#allocation5 + $0x18] sm:$0xff]  ;;  %vm126_vm0 = vcmask 130048   ;;  %s1050_s1 = smov 112  }
  0x27   :  { %v59_v1 = vld [vmem:[#allocation5 + $0x28] sm:$0xff]  ;;  %v61_v4 = vld [vmem:[#allocation5 + $0x38] sm:$0xff]  ;;  %v54_v5 = vld [vmem:[#allocation5] sm:$0xff]  ;;  %vm330_vm1 = vcmask 916480   ;;  %s1051_s16 = smov 96   ;;  %vm452_vm3 = vcmask 785408  }
  0x28   :  { %v841_v3 = vpack.c.bf16 %v59_v1, %v55_v0  ;;  %v58_v6 = vld [vmem:[#allocation5 + $0x20] sm:$0xff]  ;;  %v877_v7 = vpack.c.bf16 %v61_v4, %v57_v2  ;;  %v56_v9 = vld [vmem:[#allocation5 + $0x10] sm:$0xff]  ;;  %v63_v11 = vld [vmem:[#allocation5 + $0x48] sm:$0xff]  ;;  %vm569_vm4 = vcmask 7168  }
  0x29   :  { %v843_v8 = vpack.c.bf16 %v58_v6, %v54_v5  ;;  %v60_v10 = vld [vmem:[#allocation5 + $0x30] sm:$0xff]  ;;  %v67_v13 = vld [vmem:[#allocation5 + $0x68] sm:$0xff]  ;;  %v65_v14 = vld [vmem:[#allocation5 + $0x58] sm:$0xff] }
  0x2a   :  { %842 = vmatprep.subr.bf16.mxu0 %v841_v3  ;;  %v879_v12 = vpack.c.bf16 %v60_v10, %v56_v9  ;;  %v69_v15 = vld [vmem:[#allocation5 + $0x78] sm:$0xff]  ;;  %878 = vmatprep.subr.bf16.mxu1 %v877_v7  ;;  %v845_v16 = vpack.c.bf16 %v67_v13, %v63_v11  ;;  %v62_v18 = vld [vmem:[#allocation5 + $0x40] sm:$0xff]  ;;  %v64_v20 = vld [vmem:[#allocation5 + $0x50] sm:$0xff] }
  0x2b   :  { %844 = vmatpush1.bf16.msra.mxu0 %v843_v8  ;;  %v881_v17 = vpack.c.bf16 %v69_v15, %v65_v14  ;;  %v66_v19 = vld [vmem:[#allocation5 + $0x60] sm:$0xff]  ;;  %v68_v22 = vld [vmem:[#allocation5 + $0x70] sm:$0xff]  ;;  %v71_v23 = vld [vmem:[#allocation5 + $0x88] sm:$0xff] }
  0x2c   :  { %880 = vmatpush1.bf16.msra.mxu1 %v879_v12  ;;  %v847_v21 = vpack.c.bf16 %v66_v19, %v62_v18  ;;  %v75_v24 = vld [vmem:[#allocation5 + $0xa8] sm:$0xff]  ;;  %846 = vmatprep.subr.bf16.mxu0 %v845_v16  ;;  %v883_v25 = vpack.c.bf16 %v68_v22, %v64_v20  ;;  %v73_v27 = vld [vmem:[#allocation5 + $0x98] sm:$0xff]  ;;  %v70_v29 = vld [vmem:[#allocation5 + $0x80] sm:$0xff] }
  0x2d   :  { %882 = vmatprep.subr.bf16.mxu1 %v881_v17  ;;  %v849_v26 = vpack.c.bf16 %v75_v24, %v71_v23  ;;  %v77_v28 = vld [vmem:[#allocation5 + $0xb8] sm:$0xff]  ;;  %v74_v31 = vld [vmem:[#allocation5 + $0xa0] sm:$0xff]  ;;  %v72_v32 = vld [vmem:[#allocation5 + $0x90] sm:$0xff] }
  0x2e   :  { %v885_v30 = vpack.c.bf16 %v77_v28, %v73_v27  ;;  %v76_v33 = vld [vmem:[#allocation5 + $0xb0] sm:$0xff]  ;;  %v851_v34 = vpack.c.bf16 %v74_v31, %v70_v29  ;;  %v79_v35 = vld [vmem:[#allocation5 + $0xc8] sm:$0xff]  ;;  %v81_v37 = vld [vmem:[#allocation5 + $0xd8] sm:$0xff] }
  0x2f   :  { %848 = vmatpush1.bf16.msra.mxu0 %v847_v21  ;;  %v83_v36 = vld [vmem:[#allocation5 + $0xe8] sm:$0xff]  ;;  %v887_v38 = vpack.c.bf16 %v76_v33, %v72_v32  ;;  %v85_v40 = vld [vmem:[#allocation5 + $0xf8] sm:$0xff]  ;;  %v78_v41 = vld [vmem:[#allocation5 + $0xc0] sm:$0xff] }
  0x30   :  { %884 = vmatpush1.bf16.msra.mxu1 %v883_v25  ;;  %850 = vmatprep.subr.bf16.mxu0 %v849_v26  ;;  %v853_v39 = vpack.c.bf16 %v83_v36, %v79_v35  ;;  %v82_v42 = vld [vmem:[#allocation5 + $0xe0] sm:$0xff]  ;;  %v889_v43 = vpack.c.bf16 %v85_v40, %v81_v37  ;;  %v80_v44 = vld [vmem:[#allocation5 + $0xd0] sm:$0xff]  ;;  %v87_v46 = vld [vmem:[#allocation5 + $0x108] sm:$0xff] }
  0x31   :  { %886 = vmatprep.subr.bf16.mxu1 %v885_v30  ;;  %v84_v45 = vld [vmem:[#allocation5 + $0xf0] sm:$0xff]  ;;  %v91_v47 = vld [vmem:[#allocation5 + $0x128] sm:$0xff]  ;;  %v89_v48 = vld [vmem:[#allocation5 + $0x118] sm:$0xff]  ;;  %v855_v50 = vpack.c.bf16 %v82_v42, %v78_v41 }
  0x32   :  { %v93_v49 = vld [vmem:[#allocation5 + $0x138] sm:$0xff]  ;;  %v891_v51 = vpack.c.bf16 %v84_v45, %v80_v44  ;;  %v857_v52 = vpack.c.bf16 %v91_v47, %v87_v46  ;;  %v86_v53 = vld [vmem:[#allocation5 + $0x100] sm:$0xff]  ;;  %v88_v55 = vld [vmem:[#allocation5 + $0x110] sm:$0xff] }
  0x33   :  { %852 = vmatpush1.bf16.msra.mxu0 %v851_v34  ;;  %v90_v54 = vld [vmem:[#allocation5 + $0x120] sm:$0xff]  ;;  %v893_v56 = vpack.c.bf16 %v93_v49, %v89_v48  ;;  %v92_v57 = vld [vmem:[#allocation5 + $0x130] sm:$0xff]  ;;  %v95_v58 = vld [vmem:[#allocation5 + $0x148] sm:$0xff] }
  0x34   :  { %888 = vmatpush1.bf16.msra.mxu1 %v887_v38  ;;  %854 = vmatprep.subr.bf16.mxu0 %v853_v39  ;;  %v99_v59 = vld [vmem:[#allocation5 + $0x168] sm:$0xff]  ;;  %v97_v60 = vld [vmem:[#allocation5 + $0x158] sm:$0xff]  ;;  %v859_v62 = vpack.c.bf16 %v90_v54, %v86_v53  ;;  %v895_v63 = vpack.c.bf16 %v92_v57, %v88_v55  ;;  %v94_v1 = vld [vmem:[#allocation5 + $0x140] sm:$0xff] }
  0x35   :  { %890 = vmatprep.subr.bf16.mxu1 %v889_v43  ;;  %v101_v61 = vld [vmem:[#allocation5 + $0x178] sm:$0xff]  ;;  %v861_v0 = vpack.c.bf16 %v99_v59, %v95_v58  ;;  %v98_v2 = vld [vmem:[#allocation5 + $0x160] sm:$0xff]  ;;  %v96_v3 = vld [vmem:[#allocation5 + $0x150] sm:$0xff] }
  0x36   :  { %v897_v4 = vpack.c.bf16 %v101_v61, %v97_v60  ;;  %v100_v5 = vld [vmem:[#allocation5 + $0x170] sm:$0xff]  ;;  %v103_v6 = vld [vmem:[#allocation5 + $0x188] sm:$0xff]  ;;  %v105_v8 = vld [vmem:[#allocation5 + $0x198] sm:$0xff]  ;;  %v863_v10 = vpack.c.bf16 %v98_v2, %v94_v1 }
  0x37   :  { %856 = vmatpush1.bf16.msra.mxu0 %v855_v50  ;;  %v107_v7 = vld [vmem:[#allocation5 + $0x1a8] sm:$0xff]  ;;  %v109_v9 = vld [vmem:[#allocation5 + $0x1b8] sm:$0xff]  ;;  %v899_v11 = vpack.c.bf16 %v100_v5, %v96_v3  ;;  %v102_v13 = vld [vmem:[#allocation5 + $0x180] sm:$0xff] }
  0x38   :  { %892 = vmatpush1.bf16.msra.mxu1 %v891_v51  ;;  %858 = vmatprep.subr.bf16.mxu0 %v857_v52  ;;  %v865_v12 = vpack.c.bf16 %v107_v7, %v103_v6  ;;  %v106_v14 = vld [vmem:[#allocation5 + $0x1a0] sm:$0xff]  ;;  %v104_v15 = vld [vmem:[#allocation5 + $0x190] sm:$0xff]  ;;  %v901_v16 = vpack.c.bf16 %v109_v9, %v105_v8  ;;  %v111_v18 = vld [vmem:[#allocation5 + $0x1c8] sm:$0xff] }
  0x39   :  { %894 = vmatprep.subr.bf16.mxu1 %v893_v56  ;;  %v108_v17 = vld [vmem:[#allocation5 + $0x1b0] sm:$0xff]  ;;  %v115_v19 = vld [vmem:[#allocation5 + $0x1e8] sm:$0xff]  ;;  %v113_v20 = vld [vmem:[#allocation5 + $0x1d8] sm:$0xff]  ;;  %v867_v22 = vpack.c.bf16 %v106_v14, %v102_v13 }
  0x3a   :  { %v117_v21 = vld [vmem:[#allocation5 + $0x1f8] sm:$0xff]  ;;  %v47_v23 = vld [vmem:[#allocation3 + $0x8] sm:$0xff]  ;;  %v903_v24 = vpack.c.bf16 %v108_v17, %v104_v15  ;;  %v869_v25 = vpack.c.bf16 %v115_v19, %v111_v18  ;;  %v110_v26 = vld [vmem:[#allocation5 + $0x1c0] sm:$0xff] }
  0x3b   :  { %860 = vmatpush1.bf16.msra.mxu0 %v859_v62  ;;  %v114_v27 = vld [vmem:[#allocation5 + $0x1e0] sm:$0xff]  ;;  %v112_v28 = vld [vmem:[#allocation5 + $0x1d0] sm:$0xff]  ;;  %v905_v29 = vpack.c.bf16 %v117_v21, %v113_v20  ;;  %v119_v31 = vld [vmem:[#allocation5 + $0x208] sm:$0xff]  ;;  %819 = vmatprep.mubr.msk.f32.mxu0 %vm126_vm0, %v47_v23 }
  0x3c   :  { %896 = vmatpush1.bf16.msra.mxu1 %v895_v63  ;;  %862 = vmatprep.subr.bf16.mxu0 %v861_v0  ;;  %v116_v30 = vld [vmem:[#allocation5 + $0x1f0] sm:$0xff]  ;;  %v123_v32 = vld [vmem:[#allocation5 + $0x228] sm:$0xff]  ;;  %v121_v33 = vld [vmem:[#allocation5 + $0x218] sm:$0xff]  ;;  %v871_v35 = vpack.c.bf16 %v114_v27, %v110_v26 }
  0x3d   :  { %898 = vmatprep.subr.bf16.mxu1 %v897_v4  ;;  %v125_v34 = vld [vmem:[#allocation5 + $0x238] sm:$0xff]  ;;  %823 = vmatprep.mubr.msk.f32.mxu1 %vm126_vm0, %v47_v23  ;;  %v907_v36 = vpack.c.bf16 %v116_v30, %v112_v28  ;;  %v873_v37 = vpack.c.bf16 %v123_v32, %v119_v31  ;;  %v118_v38 = vld [vmem:[#allocation5 + $0x200] sm:$0xff]  ;;  %v120_v41 = vld [vmem:[#allocation5 + $0x210] sm:$0xff] }
  0x3e   :  { %v122_v39 = vld [vmem:[#allocation5 + $0x220] sm:$0xff]  ;;  %v909_v40 = vpack.c.bf16 %v125_v34, %v121_v33  ;;  %v124_v42 = vld [vmem:[#allocation5 + $0x230] sm:$0xff]  ;;  %v49_v46 = vld [vmem:[#allocation3 + $0x18] sm:$0xff] }
  0x3f   :  { %864 = vmatpush1.bf16.msra.mxu0 %v863_v10  ;;  %v875_v43 = vpack.c.bf16 %v122_v39, %v118_v38  ;;  %v911_v44 = vpack.c.bf16 %v124_v42, %v120_v41  ;;  %v46_v45 = vld [vmem:[#allocation3] sm:$0xff]  ;;  %v48_v47 = vld [vmem:[#allocation3 + $0x10] sm:$0xff]  ;;  %v51_v48 = vld [vmem:[#allocation3 + $0x28] sm:$0xff] }
  0x40   :  { %900 = vmatpush1.bf16.msra.mxu1 %v899_v11  ;;  %866 = vmatprep.subr.bf16.mxu0 %v865_v12  ;;  %v50_v49 = vld [vmem:[#allocation3 + $0x20] sm:$0xff]  ;;  %v53_v50 = vld [vmem:[#allocation3 + $0x38] sm:$0xff]  ;;  %v52_v51 = vld [vmem:[#allocation3 + $0x30] sm:$0xff] }
  0x41   :  { %902 = vmatprep.subr.bf16.mxu1 %v901_v16  ;;  %vm1141_vm2 = vmpackc.low %vm126_vm0, %vm126_vm0 }
  0x43   :  { %868 = vmatpush1.bf16.msra.mxu0 %v867_v22 }
  0x44   :  { %904 = vmatpush1.bf16.msra.mxu1 %v903_v24  ;;  %870 = vmatprep.subr.bf16.mxu0 %v869_v25 }
  0x45   :  { %906 = vmatprep.subr.bf16.mxu1 %v905_v29 }
  0x47   :  { %872 = vmatpush1.bf16.msra.mxu0 %v871_v35 }
  0x48   :  { %908 = vmatpush1.bf16.msra.mxu1 %v907_v36  ;;  %874 = vmatprep.subr.bf16.mxu0 %v873_v37 }
  0x49   :  { %910 = vmatprep.subr.bf16.mxu1 %v909_v40 }
  0x4b   :  { %876 = vmatpush1.bf16.msra.mxu0 %v875_v43 }
  0x4c   :  { %912 = vmatpush1.bf16.msra.mxu1 %v911_v44 }
  0x4e   :  { %204 = vmatmul.mubr.f32.vlgmr.msra.gmra.mrb[0].mxu0 %v46_v45 }
  0x4f   :  { %293 = vmatmul.mubr.f32.vlgmr.msra.gmra.mrb[0].mxu1 %v46_v45  ;;  %820 = vmatprep.mubr.msk.f32.mxu0 %vm126_vm0, %v49_v46 }
  0x50   :  { %824 = vmatprep.mubr.msk.f32.mxu1 %vm126_vm0, %v49_v46 }
  0x52   :  { %210 = vmatmul.mubr.f32.gmra.mrb[2].mxu0 %v48_v47 }
  0x53   :  { %299 = vmatmul.mubr.f32.gmra.mrb[2].mxu1 %v48_v47  ;;  %821 = vmatprep.mubr.msk.f32.mxu0 %vm126_vm0, %v51_v48 }
  0x54   :  { %825 = vmatprep.mubr.msk.f32.mxu1 %vm126_vm0, %v51_v48 }
  0x56   :  { %216 = vmatmul.mubr.f32.gmra.mrb[4].mxu0 %v50_v49 }
  0x57   :  { %305 = vmatmul.mubr.f32.gmra.mrb[4].mxu1 %v50_v49  ;;  %822 = vmatprep.mubr.msk.f32.mxu0 %vm126_vm0, %v53_v50 }
  0x58   :  { %826 = vmatprep.mubr.msk.f32.mxu1 %vm126_vm0, %v53_v50 }
  0x5a   :  { %222 = vmatmul.mubr.f32.gmra.mrb[6].mxu0 %v52_v51 }
  0x5b   :  { %311 = vmatmul.mubr.f32.gmra.mrb[6].mxu1 %v52_v51 }
 0x121   :  { %v205_v52 = vpop.f32.mrb[0].mxu0 }
 0x122   :  { %v1110_v53 = vpop.f32.mrb[0].mxu1  ;;  %v207_v54 = vpop.f32.mrb[1].mxu0 }
 0x123   :  { %v1112_v55 = vpop.f32.mrb[1].mxu1  ;;  %829 = vmatprep.mubr.msk.f32.mxu0 %vm126_vm0, %v207_v54  ;;  %v940_v56 = vpack.i.bf16 %v1110_v53, %v207_v54 }
 0x124   :  { %v960_v57 = vpack.i.bf16 %v1112_v55, %v1110_v53 }
 0x125   :  { %941 = vrot.lane.b32.xlu0 %v940_v56, %s1050_s1  ;;  %v211_v58 = vpop.f32.mrb[2].mxu0 }
 0x126   :  { %v1118_v59 = vpop.f32.mrb[2].mxu1  ;;  %v213_v60 = vpop.f32.mrb[3].mxu0 }
 0x127   :  { %v945_v61 = vpack.i.bf16 %v1118_v59, %v213_v60  ;;  %v1121_v62 = vpop.f32.mrb[3].mxu1 }
 0x128   :  { %v965_v63 = vpack.i.bf16 %v1121_v62, %v1118_v59 }
 0x129   :  { %946 = vrot.lane.b32.xlu0 %v945_v61, %s1050_s1  ;;  %v217_v0 = vpop.f32.mrb[4].mxu0 }
 0x12a   :  { %v1125_v1 = vpop.f32.mrb[4].mxu1  ;;  %v219_v2 = vpop.f32.mrb[5].mxu0 }
 0x12b   :  { %v1127_v3 = vpop.f32.mrb[5].mxu1  ;;  %v950_v4 = vpack.i.bf16 %v1125_v1, %v219_v2 }
 0x12c   :  { %v970_v5 = vpack.i.bf16 %v1127_v3, %v1125_v1 }
 0x12d   :  { %951 = vrot.lane.b32.xlu1 %v950_v4, %s1050_s1  ;;  %v223_v6 = vpop.f32.mrb[6].mxu0 }
 0x12e   :  { %v1132_v7 = vpop.f32.mrb[6].mxu1  ;;  %v225_v8 = vpop.f32.mrb[7].mxu0 }
 0x12f   :  { %v955_v9 = vpack.i.bf16 %v1132_v7, %v225_v8  ;;  %v1135_v10 = vpop.f32.mrb[7].mxu1 }
 0x130   :  { %v975_v11 = vpack.i.bf16 %v1135_v10, %v1132_v7 }
 0x131   :  { %956 = vrot.lane.b32.xlu1 %v955_v9, %s1050_s1 }
 0x197   :  { %v942_v12 = vpop.permute.xlu0 %941 }
 0x198   :  { %v944_v13 = vunpack.i.h.bf16 %v942_v12  ;;  %v943_v14 = vunpack.i.l.bf16 %v942_v12 }
 0x19a   :  { %v331_v19 = vsel %vm330_vm1, %v943_v14, %v944_v13  ;;  %v1052_v14 = vmov 0.0  }
 0x19b   :  { %v947_v15 = vpop.permute.xlu0 %946  ;;  %529 = vmatprep.mubr.f32.mxu1 %v1052_v14 }
 0x19c   :  { %v949_v16 = vunpack.i.h.bf16 %v947_v15  ;;  %v948_v17 = vunpack.i.l.bf16 %v947_v15 }
 0x19e   :  { %v913_v20 = vpack.c.bf16 %v949_v16, %v944_v13  ;;  %v332_v21 = vsel %vm330_vm1, %v948_v17, %v949_v16 }
 0x19f   :  { %v916_v22 = vpack.c.bf16 %v332_v21, %v331_v19  ;;  %v952_v23 = vpop.permute.xlu1 %951 }
 0x1a0   :  { %915 = vmatprep.subr.msk.bf16.mxu0 %vm1141_vm2, %v913_v20  ;;  %v954_v24 = vunpack.i.h.bf16 %v952_v23  ;;  %v953_v25 = vunpack.i.l.bf16 %v952_v23 }
 0x1a1   :  { %917 = vmatpush1.bf16.xpose.msra.mxu0 %v916_v22 }
 0x1a2   :  { %v584_v29 = vsel %vm330_vm1, %v953_v25, %v954_v24 }
 0x1a3   :  { %v957_v26 = vpop.permute.xlu1 %956 }
 0x1a4   :  { %v959_v27 = vunpack.i.h.bf16 %v957_v26  ;;  %v958_v28 = vunpack.i.l.bf16 %v957_v26 }
 0x1a6   :  { %v922_v30 = vpack.c.bf16 %v959_v27, %v954_v24  ;;  %v585_v31 = vsel %vm330_vm1, %v958_v28, %v959_v27 }
 0x1a7   :  { %v925_v32 = vpack.c.bf16 %v585_v31, %v584_v29 }
 0x1a8   :  { %408 = vmatmul.mubr.f32.vlgmr.msra.gmra.mrb[8].mxu0 %v205_v52  ;;  %924 = vmatprep.subr.msk.bf16.mxu0 %vm1141_vm2, %v922_v30 }
 0x1a9   :  { %830 = vmatprep.mubr.msk.f32.mxu0 %vm126_vm0, %v213_v60  ;;  %926 = vmatpush1.bf16.xpose.msra.mxu0 %v925_v32 }
 0x1ac   :  { %413 = vmatmul.mubr.f32.gmra.mrb[10].mxu0 %v211_v58 }
 0x1ad   :  { %835 = vmatprep.mubr.msk.f32.mxu0 %vm126_vm0, %v219_v2 }
 0x1b0   :  { %661 = vmatmul.mubr.f32.vlgmr.msra.gmra.mrb[12].mxu0 %v217_v0 }
 0x1b1   :  { %836 = vmatprep.mubr.msk.f32.mxu0 %vm126_vm0, %v225_v8 }
 0x1b4   :  { %666 = vmatmul.mubr.f32.gmra.mrb[14].mxu0 %v223_v6 }
 0x27b   :  { %v409_v33 = vpop.f32.mrb[8].mxu0 }
 0x27c   :  { %v418_v34 = vmul.f32 0.083333336, %v409_v33  ;;  %v411_v35 = vpop.f32.mrb[9].mxu0 }
 0x27e   :  { %v420_v36 = vsel %vm126_vm0, %v418_v34, -inf }
 0x27f   :  { %421 = vmax.xlane.f32.xlu0 %v420_v36  ;;  %v414_v37 = vpop.f32.mrb[10].mxu0 }
 0x280   :  { %v419_v38 = vmul.f32 0.083333336, %v414_v37  ;;  %v416_v39 = vpop.f32.mrb[11].mxu0 }
 0x282   :  { %v423_v40 = vsel %vm126_vm0, %v419_v38, -inf }
 0x283   :  { %424 = vmax.xlane.f32.xlu1 %v423_v40  ;;  %v662_v41 = vpop.f32.mrb[12].mxu0 }
 0x284   :  { %v671_v42 = vmul.f32 0.083333336, %v662_v41  ;;  %v664_v43 = vpop.f32.mrb[13].mxu0  ;;  %v317_v41 = vld [vmem:[%s1212_s2] sm:$0x3] }
 0x286   :  { %v673_v44 = vsel %vm126_vm0, %v671_v42, -inf }
 0x287   :  { %674 = vmax.xlane.f32.xlu0 %v673_v44  ;;  %v667_v45 = vpop.f32.mrb[14].mxu0 }
 0x288   :  { %v672_v46 = vmul.f32 0.083333336, %v667_v45  ;;  %v669_v47 = vpop.f32.mrb[15].mxu0 }
 0x28a   :  { %v676_v48 = vsel %vm126_vm0, %v672_v46, -inf }
 0x28b   :  { %677 = vmax.xlane.f32.xlu0 %v676_v48 }
 0x294   :  { %961 = vrot.lane.b32.xlu1 %v960_v57, %s1051_s16 }
 0x30c   :  { %v422_v49 = vpop.xlane.xlu0 %421 }
 0x30d   :  { %v426_v50 = vsub.f32 %v418_v34, %v422_v49 }
 0x30f   :  { %v428_v51 = vmul.f32 1.442695, %v426_v50 }
 0x310   :  { %v425_v52 = vpop.xlane.xlu1 %424 }
 0x311   :  { %980 = vpow2.f32 %v428_v51  ;;  %v427_v54 = vsub.f32 %v419_v38, %v425_v52  ;;  %v543_v38 = vlaneseq }
 0x313   :  { %v430_v56 = vmul.f32 1.442695, %v427_v54  ;;  %v544_v39 = vshrl.u32 %v543_v38, 7 }
 0x314   :  { %v675_v58 = vpop.xlane.xlu0 %674  ;;  %v962_v15 = vpop.permute.xlu1 %961 }
 0x315   :  { %982 = vpow2.f32 %v430_v56  ;;  %v679_v60 = vsub.f32 %v671_v42, %v675_v58  ;;  %v964_v3 = vunpack.i.h.bf16 %v962_v15  ;;  %v549_v40 = vsub.s32 1, %v544_v39 }
 0x316   :  { %v545_v42 = vsub.s32 0, %v544_v39 }
 0x317   :  { %v681_v61 = vmul.f32 1.442695, %v679_v60  ;;  %v550_v43 = vrot.slane %v317_v41, %v549_v40 }
 0x318   :  { %v678_v0 = vpop.xlane.xlu0 %677  ;;  %v546_v44 = vrot.slane %v317_v41, %v545_v42 }
 0x319   :  { %984 = vpow2.f32 %v681_v61  ;;  %v680_v2 = vsub.f32 %v672_v46, %v678_v0 }
 0x31b   :  { %v981_v4 = vpop.eup %980  ;;  %v683_v6 = vmul.f32 1.442695, %v680_v2 }
 0x31c   :  { %v432_v8 = vsel %vm126_vm0, %v981_v4, 0.0 }
 0x31d   :  { %986 = vpow2.f32 %v683_v6  ;;  %433 = vadd.xlane.f32.xlu1 %v432_v8 }
 0x31f   :  { %v983_v53 = vpop.eup %982 }
 0x320   :  { %v435_v55 = vsel %vm126_vm0, %v983_v53, 0.0 }
 0x321   :  { %436 = vadd.xlane.f32.xlu0 %v435_v55 }
 0x323   :  { %v985_v57 = vpop.eup %984 }
 0x324   :  { %v685_v9 = vsel %vm126_vm0, %v985_v57, 0.0 }
 0x325   :  { %686 = vadd.xlane.f32.xlu1 %v685_v9 }
 0x327   :  { %v987_v12 = vpop.eup %986 }
 0x328   :  { %v688_v13 = vsel %vm126_vm0, %v987_v12, 0.0 }
 0x329   :  { %689 = vadd.xlane.f32.xlu0 %v688_v13 }
 0x336   :  { %971 = vrot.lane.b32.xlu1 %v970_v5, %s1051_s16  ;;  %v963_v5 = vunpack.i.l.bf16 %v962_v15 }
 0x338   :  { %v453_v62 = vsel %vm452_vm3, %v963_v5, %v964_v3 }
 0x33a   :  { %976 = vrot.lane.b32.xlu1 %v975_v11, %s1051_s16 }
 0x33f   :  { %966 = vrot.lane.b32.xlu0 %v965_v63, %s1051_s16 }
 0x3aa   :  { %v434_v16 = vpop.xlane.xlu1 %433 }
 0x3ab   :  { %988 = vrcp.f32 %v434_v16 }
 0x3ae   :  { %v437_v17 = vpop.xlane.xlu0 %436 }
 0x3af   :  { %990 = vrcp.f32 %v437_v17 }
 0x3b2   :  { %v687_v18 = vpop.xlane.xlu1 %686 }
 0x3b3   :  { %992 = vrcp.f32 %v687_v18 }
 0x3b5   :  { %v989_v25 = vpop.eup %988 }
 0x3b6   :  { %v972_v19 = vpop.permute.xlu1 %971  ;;  %v690_v1 = vpop.xlane.xlu0 %689  ;;  %v440_v29 = vmul.f32 %v989_v25, %v981_v4 }
 0x3b7   :  { %v974_v63 = vunpack.i.h.bf16 %v972_v19  ;;  %v973_v22 = vunpack.i.l.bf16 %v972_v19  ;;  %994 = vrcp.f32 %v690_v1 }
 0x3b9   :  { %v705_v30 = vsel %vm452_vm3, %v973_v22, %v974_v63  ;;  %v991_v31 = vpop.eup %990 }
 0x3ba   :  { %v977_v7 = vpop.permute.xlu1 %976  ;;  %v967_v10 = vpop.permute.xlu0 %966  ;;  %v441_v33 = vmul.f32 %v991_v31, %v983_v53 }
 0x3bb   :  { %v979_v11 = vunpack.i.h.bf16 %v977_v7  ;;  %v978_v20 = vunpack.i.l.bf16 %v977_v7  ;;  %v969_v21 = vunpack.i.h.bf16 %v967_v10  ;;  %v968_v59 = vunpack.i.l.bf16 %v967_v10 }
 0x3bd   :  { %v918_v23 = vpack.c.bf16 %v969_v21, %v964_v3  ;;  %v454_v24 = vsel %vm452_vm3, %v968_v59, %v969_v21  ;;  %v706_v27 = vsel %vm452_vm3, %v978_v20, %v979_v11  ;;  %v927_v28 = vpack.c.bf16 %v979_v11, %v974_v63  ;;  %v993_v34 = vpop.eup %992 }
 0x3be   :  { %v920_v26 = vpack.c.bf16 %v454_v24, %v453_v62  ;;  %v929_v32 = vpack.c.bf16 %v706_v27, %v705_v30  ;;  %v693_v35 = vmul.f32 %v993_v34, %v985_v57 }
 0x3bf   :  { %919 = vmatprep.subr.bf16.mxu1 %v918_v23 }
 0x3c0   :  { %921 = vmatpush1.bf16.msra.mxu1 %v920_v26 }
 0x3c1   :  { %928 = vmatprep.subr.bf16.mxu1 %v927_v28  ;;  %v995_v36 = vpop.eup %994 }
 0x3c2   :  { %v694_v37 = vmul.f32 %v995_v36, %v987_v12 }
 0x3c3   :  { %831 = vmatmul.mubr.msk.f32.vlgmr.msra.gmra.mrb[8].mxu1 %vm126_vm0, %v440_v29 }
 0x3c4   :  { %930 = vmatpush1.bf16.msra.mxu1 %v929_v32  ;;  %535 = vmatprep.mubr.f32.mxu1 %v1052_v14 }
 0x3c7   :  { %832 = vmatmul.mubr.msk.f32.gmra.mrb[10].mxu1 %vm126_vm0, %v441_v33 }
 0x3c8   :  { %781 = vmatprep.mubr.f32.mxu1 %v1052_v14 }
 0x3cb   :  { %837 = vmatmul.mubr.msk.f32.vlgmr.msra.gmra.mrb[12].mxu1 %vm126_vm0, %v693_v35 }
 0x3cc   :  { %787 = vmatprep.mubr.f32.mxu1 %v1052_v14  ;;  %v566_v14 = vstv %s1213_s3 }
 0x3cf   :  { %838 = vmatmul.mubr.msk.f32.gmra.mrb[14].mxu1 %vm126_vm0, %v694_v37 }
 0x496   :  { %v531_v45 = vpop.f32.mrb[8].mxu1 }
 0x497   :  { %v533_v46 = vpop.f32.mrb[9].mxu1  ;;  %v553_v48 = vmul.f32 %v546_v44, %v531_v45 }
 0x498   :  { %v554_v47 = vmul.f32 %v550_v43, %v533_v46 }
 0x49a   :  { %v537_v49 = vpop.f32.mrb[10].mxu1  ;;  %v557_v50 = vsel %vm126_vm0, %v554_v47, 0.0 }
 0x49b   :  { %v539_v51 = vpop.f32.mrb[11].mxu1  ;;  %v558_v52 = vadd.f32 %v557_v50, %v553_v48  ;;  %v555_v56 = vmul.f32 %v546_v44, %v537_v49 }
 0x49c   :  { %v556_v54 = vmul.f32 %v550_v43, %v539_v51 }
 0x49d   :  { %559 = vadd.xlane.f32.xlu0 %v558_v52 }
 0x49e   :  { %v783_v58 = vpop.f32.mrb[12].mxu1  ;;  %v561_v60 = vsel %vm126_vm0, %v556_v54, 0.0 }
 0x49f   :  { %v785_v61 = vpop.f32.mrb[13].mxu1  ;;  %v562_v0 = vadd.f32 %v561_v60, %v555_v56  ;;  %v794_v4 = vmul.f32 %v783_v58, %v546_v44 }
 0x4a0   :  { %v795_v2 = vmul.f32 %v785_v61, %v550_v43 }
 0x4a1   :  { %563 = vadd.xlane.f32.xlu1 %v562_v0 }
 0x4a2   :  { %v789_v6 = vpop.f32.mrb[14].mxu1  ;;  %v798_v8 = vsel %vm126_vm0, %v795_v2, 0.0 }
 0x4a3   :  { %v791_v53 = vpop.f32.mrb[15].mxu1  ;;  %v799_v55 = vadd.f32 %v798_v8, %v794_v4  ;;  %v796_v9 = vmul.f32 %v789_v6, %v546_v44 }
 0x4a4   :  { %v797_v57 = vmul.f32 %v791_v53, %v550_v43 }
 0x4a5   :  { %800 = vadd.xlane.f32.xlu0 %v799_v55 }
 0x4a6   :  { %v802_v12 = vsel %vm126_vm0, %v797_v57, 0.0 }
 0x4a7   :  { %v803_v13 = vadd.f32 %v802_v12, %v796_v9 }
 0x4a9   :  { %804 = vadd.xlane.f32.xlu0 %v803_v13 }
 0x52a   :  { %v560_v15 = vpop.xlane.xlu0 %559 }
 0x52b   :  { %v567_v16 = vadd.f32 %v566_v14, %v560_v15 }
 0x52d   :  { %570 = vst.msk [vmem:[%s1214_s4] sm:$0xff] %vm569_vm4, %v567_v16 }
 0x52e   :  { %v564_v17 = vpop.xlane.xlu1 %563 }
 0x52f   :  { %v568_v18 = vadd.f32 %v566_v14, %v564_v17 }
 0x531   :  { %571 = vst.msk [vmem:[%s1214_s4 + $0x8] sm:$0xff] %vm569_vm4, %v568_v18 }
 0x532   :  { %v801_v19 = vpop.xlane.xlu0 %800 }
 0x533   :  { %v808_v1 = vadd.f32 %v801_v19, %v566_v14 }
 0x535   :  { %839 = vst.msk [vmem:[%s1214_s4 + $0x10] sm:$0xff] %vm569_vm4, %v808_v1 }
 0x536   :  { %v805_v3 = vpop.xlane.xlu0 %804 }
 0x537   :  { %v809_v5 = vadd.f32 %v805_v3, %v566_v14 }
 0x539   :  { %840 = vst.msk [vmem:[%s1214_s4 + $0x18] sm:$0xff] %vm569_vm4, %v809_v5 }
 0x53a   :  { %817 = vsyncpa [#allocation4], 1 }
 0x53b   :  { %818 = vsyncpa [#allocation6], 1 }

</bundles_post_ra>
